<compile_context>
chip_gen: v7x
topology: tpu7x:2x2x1
jax: 0.10.0
libtpu: 0.0.40
codegen_flags: <defaults>
</compile_context>

<pallas_src>
import jax
import jax.numpy as jnp
from jax.experimental import pallas as pl
from jax.experimental.pallas import tpu as pltpu

NUM_NODES = 12
IN_CHANNELS = NUM_NODES   # data.x = eye(num_nodes)
HIDDEN = 16
OUT_CHANNELS = 2          # labels are {0, 1}
BN_EPS = 1e-5

# Packed slab layout: f32[72, 16], all region starts 16-aligned (sublane tiles).
SLAB_ROWS = 72
_A_R0 = 0      # rows  0:12, cols 0:12   normalized adjacency
_W1_R0 = 16    # rows 16:28               W1 [12, 16]
_W2_R0 = 32    # rows 32:48               W2 [16, 16]
_W3_R0 = 48    # rows 48:64               W3 padded [16, 16] (cols 0:2 real)
_P_R0 = 64     # rows 64:69               g1, beta1, g2, beta2, b3(padded)


def _batchnorm_relu(h, gamma, beta):
    """BatchNorm1d over the node axis (biased variance, eps=1e-5), then ReLU.

    var = E[x^2] - mean^2 so the two XLU reductions are independent; gamma is
    folded into the normalization scale; shift = beta - mean*scale.
    """
    mean = jnp.mean(h, axis=0, keepdims=True)
    msq = jnp.mean(h * h, axis=0, keepdims=True)
    var = jnp.maximum(msq - mean * mean, 0.0)     # clamp: avoid NaN from cancellation
    scale = gamma * jax.lax.rsqrt(var + BN_EPS)
    shift = beta - mean * scale
    return jnp.maximum(h * scale + shift, 0.0)


def gcn_kernel(s_ref, out_ref):
    s = s_ref[...]                                         # [72, 16] packed slab

    a = s[_A_R0:_A_R0 + NUM_NODES, 0:NUM_NODES]            # [12, 12]
    w1 = s[_W1_R0:_W1_R0 + IN_CHANNELS, :]                 # [12, 16]
    w2 = s[_W2_R0:_W2_R0 + HIDDEN, :]                      # [16, 16]
    w3 = s[_W3_R0:_W3_R0 + HIDDEN, :]                      # [16, 16] cols 2:16 zero
    g1, be1 = s[_P_R0 + 0:_P_R0 + 1, :], s[_P_R0 + 1:_P_R0 + 2, :]
    g2, be2 = s[_P_R0 + 2:_P_R0 + 3, :], s[_P_R0 + 3:_P_R0 + 4, :]
    b3 = s[_P_R0 + 4:_P_R0 + 5, :]                         # [1, 16] cols 2:16 zero

    # Layer 1: X == eye(N) so X @ W1 == W1; bias b1 cancelled by BatchNorm.
    h = jnp.dot(a, w1, preferred_element_type=jnp.float32)
    h = _batchnorm_relu(h, g1, be1)

    # Layer 2: GCNConv -> BatchNorm -> ReLU (bias b2 cancelled by BatchNorm).
    h = jnp.dot(h, w2, preferred_element_type=jnp.float32)
    h = jnp.dot(a, h, preferred_element_type=jnp.float32)
    h = _batchnorm_relu(h, g2, be2)

    # Layer 3: GCNConv at full 16-lane width; real outputs live in cols 0:2.
    h = jnp.dot(h, w3, preferred_element_type=jnp.float32)
    h = jnp.dot(a, h, preferred_element_type=jnp.float32) + b3

    out_ref[...] = h.astype(out_ref.dtype)


# Advisory cost: 5 small matmuls (layer 3 at padded 16-lane width) + 2 rsqrt rows.
_FLOPS = 2 * (12 * 12 * 16) + 2 * (2 * (12 * 16 * 16) + 2 * (12 * 12 * 16))
_BYTES = SLAB_ROWS * HIDDEN * 4 + NUM_NODES * HIDDEN * 4
_COST = pl.CostEstimate(flops=_FLOPS, transcendentals=2 * HIDDEN, bytes_accessed=_BYTES)


@jax.jit
def gcn_forward(slab):
    vmem = pl.BlockSpec(memory_space=pltpu.MemorySpace.VMEM)
    out16 = pl.pallas_call(
        gcn_kernel,
        out_shape=jax.ShapeDtypeStruct((NUM_NODES, HIDDEN), jnp.float32),
        in_specs=[vmem],
        out_specs=vmem,
        cost_estimate=_COST,
    )(slab)
    # Lane-dense 16-wide store inside the kernel; narrow slice fuses out here.
    return out16[:, :OUT_CHANNELS]


def pack_slab(a_norm, params):
    (w1, b1, g1, be1, w2, b2, g2, be2, w3, b3) = params
    s = jnp.zeros((SLAB_ROWS, HIDDEN), jnp.float32)
    s = s.at[_A_R0:_A_R0 + NUM_NODES, 0:NUM_NODES].set(a_norm)
    s = s.at[_W1_R0:_W1_R0 + IN_CHANNELS, :].set(w1)
    s = s.at[_W2_R0:_W2_R0 + HIDDEN, :].set(w2)
    s = s.at[_W3_R0:_W3_R0 + HIDDEN, 0:OUT_CHANNELS].set(w3)
    s = s.at[_P_R0 + 0:_P_R0 + 1, :].set(g1)
    s = s.at[_P_R0 + 1:_P_R0 + 2, :].set(be1)
    s = s.at[_P_R0 + 2:_P_R0 + 3, :].set(g2)
    s = s.at[_P_R0 + 3:_P_R0 + 4, :].set(be2)
    s = s.at[_P_R0 + 4:_P_R0 + 5, 0:OUT_CHANNELS].set(b3)
    # b1 / b2 intentionally not packed: exactly cancelled by BatchNorm.
    return s


def build_normalized_adjacency():
    # edge_index: ring graph, both directions (same as the PyTorch snippet).
    src = jnp.arange(NUM_NODES)
    dst = (src + 1) % NUM_NODES
    adj = jnp.zeros((NUM_NODES, NUM_NODES), dtype=jnp.float32)
    adj = adj.at[src, dst].set(1.0)
    adj = adj.at[dst, src].set(1.0)
    # GCNConv: add self loops, symmetric normalization D^{-1/2} A_hat D^{-1/2}.
    a_hat = adj + jnp.eye(NUM_NODES, dtype=jnp.float32)
    deg = jnp.sum(a_hat, axis=1)
    d_inv_sqrt = 1.0 / jnp.sqrt(deg)
    return a_hat * d_inv_sqrt[:, None] * d_inv_sqrt[None, :]


def init_params(key):
    def glorot(k, shape):
        fan_in, fan_out = shape
        limit = jnp.sqrt(6.0 / (fan_in + fan_out))
        return jax.random.uniform(k, shape, jnp.float32, -limit, limit)

    k1, k2, k3, k4, k5, k6 = jax.random.split(key, 6)
    w1 = glorot(k1, (IN_CHANNELS, HIDDEN))
    b1 = 0.1 * jax.random.normal(k4, (1, HIDDEN), jnp.float32)  # nonzero: proves BN cancellation
    g1 = jnp.ones((1, HIDDEN), jnp.float32)
    be1 = jnp.zeros((1, HIDDEN), jnp.float32)
    w2 = glorot(k2, (HIDDEN, HIDDEN))
    b2 = 0.1 * jax.random.normal(k5, (1, HIDDEN), jnp.float32)
    g2 = jnp.ones((1, HIDDEN), jnp.float32)
    be2 = jnp.zeros((1, HIDDEN), jnp.float32)
    w3 = glorot(k3, (HIDDEN, OUT_CHANNELS))
    b3 = 0.1 * jax.random.normal(k6, (1, OUT_CHANNELS), jnp.float32)
    return (w1, b1, g1, be1, w2, b2, g2, be2, w3, b3)


def ref_forward(a, x, params):
    # Pure-JAX reference of the ORIGINAL forward (x, b1, b2 all applied,
    # textbook BatchNorm formula) -- validates every in-kernel transformation.
    (w1, b1, g1, be1, w2, b2, g2, be2, w3, b3) = params

    def bn_relu(h, g, be):
        m = h.mean(axis=0, keepdims=True)
        v = ((h - m) ** 2).mean(axis=0, keepdims=True)
        return jnp.maximum((h - m) / jnp.sqrt(v + BN_EPS) * g + be, 0.0)

    h = bn_relu(a @ (x @ w1) + b1, g1, be1)
    h = bn_relu(a @ (h @ w2) + b2, g2, be2)
    return a @ (h @ w3) + b3


if __name__ == "__main__":
    key = jax.random.PRNGKey(0)
    a_norm = build_normalized_adjacency()          # [12, 12]
    x = jnp.eye(NUM_NODES, dtype=jnp.float32)      # [12, 12] one-hot node features
    params = init_params(key)
    slab = pack_slab(a_norm, params)               # [72, 16] single packed input

    out = gcn_forward(slab)
    jax.block_until_ready(out)

    expected = ref_forward(a_norm, x, params)
    assert out.shape == (NUM_NODES, OUT_CHANNELS)
    assert jnp.allclose(out, expected, atol=1e-3, rtol=1e-3)
    print("KERNEL_OK")
</pallas_src>

<mosaic_0001>
module attributes {stable_mosaic.version = 11 : i64} {
  func.func @gcn_kernel(%arg0: memref<72x16xf32, #tpu.memory_space<vmem>>, %arg1: memref<12x16xf32, #tpu.memory_space<vmem>>) attributes {dimension_semantics = [], scalar_prefetch = 0 : i64, scratch_operands = 0 : i64, tpu.core_type = #tpu.core_type<tc>} {
    %c0 = arith.constant 0 : index
    %c0_0 = arith.constant 0 : index
    %0 = vector.load %arg0[%c0, %c0_0] : memref<72x16xf32, #tpu.memory_space<vmem>>, vector<72x16xf32>
    %1 = vector.extract_strided_slice %0 {offsets = [0, 0], sizes = [12, 12], strides = [1, 1]} : vector<72x16xf32> to vector<12x12xf32>
    %2 = vector.extract_strided_slice %0 {offsets = [16, 0], sizes = [12, 16], strides = [1, 1]} : vector<72x16xf32> to vector<12x16xf32>
    %3 = vector.extract_strided_slice %0 {offsets = [32, 0], sizes = [16, 16], strides = [1, 1]} : vector<72x16xf32> to vector<16x16xf32>
    %4 = vector.extract_strided_slice %0 {offsets = [48, 0], sizes = [16, 16], strides = [1, 1]} : vector<72x16xf32> to vector<16x16xf32>
    %5 = vector.extract_strided_slice %0 {offsets = [64, 0], sizes = [1, 16], strides = [1, 1]} : vector<72x16xf32> to vector<1x16xf32>
    %6 = vector.extract_strided_slice %0 {offsets = [65, 0], sizes = [1, 16], strides = [1, 1]} : vector<72x16xf32> to vector<1x16xf32>
    %7 = vector.extract_strided_slice %0 {offsets = [66, 0], sizes = [1, 16], strides = [1, 1]} : vector<72x16xf32> to vector<1x16xf32>
    %8 = vector.extract_strided_slice %0 {offsets = [67, 0], sizes = [1, 16], strides = [1, 1]} : vector<72x16xf32> to vector<1x16xf32>
    %9 = vector.extract_strided_slice %0 {offsets = [68, 0], sizes = [1, 16], strides = [1, 1]} : vector<72x16xf32> to vector<1x16xf32>
    %cst = arith.constant dense<0.000000e+00> : vector<12x16xf32>
    %10 = tpu.matmul %1, %2, %cst {dimension_numbers = #tpu.dot_dimension_numbers<[1], [0], [0], [1], [0, 0, 1, 1], [], []>} : vector<12x12xf32>, vector<12x16xf32>, vector<12x16xf32> -> vector<12x16xf32>
    %cst_1 = arith.constant dense<0.000000e+00> : vector<16xf32>
    %11 = vector.multi_reduction <add>, %10, %cst_1 [0] : vector<12x16xf32> to vector<16xf32>
    %12 = vector.shape_cast %11 : vector<16xf32> to vector<1x16xf32>
    %cst_2 = arith.constant 1.200000e+01 : f32
    %13 = vector.broadcast %cst_2 : f32 to vector<1x16xf32>
    %14 = arith.divf %12, %13 : vector<1x16xf32>
    %15 = arith.mulf %10, %10 : vector<12x16xf32>
    %cst_3 = arith.constant dense<0.000000e+00> : vector<16xf32>
    %16 = vector.multi_reduction <add>, %15, %cst_3 [0] : vector<12x16xf32> to vector<16xf32>
    %17 = vector.shape_cast %16 : vector<16xf32> to vector<1x16xf32>
    %cst_4 = arith.constant 1.200000e+01 : f32
    %18 = vector.broadcast %cst_4 : f32 to vector<1x16xf32>
    %19 = arith.divf %17, %18 : vector<1x16xf32>
    %20 = arith.mulf %14, %14 : vector<1x16xf32>
    %21 = arith.subf %19, %20 : vector<1x16xf32>
    %cst_5 = arith.constant 0.000000e+00 : f32
    %22 = vector.broadcast %cst_5 : f32 to vector<1x16xf32>
    %23 = arith.maximumf %21, %22 : vector<1x16xf32>
    %cst_6 = arith.constant 9.99999974E-6 : f32
    %24 = vector.broadcast %cst_6 : f32 to vector<1x16xf32>
    %25 = arith.addf %23, %24 : vector<1x16xf32>
    %26 = math.rsqrt %25 : vector<1x16xf32>
    %27 = arith.mulf %5, %26 : vector<1x16xf32>
    %28 = arith.mulf %14, %27 : vector<1x16xf32>
    %29 = arith.subf %6, %28 : vector<1x16xf32>
    %30 = vector.broadcast %27 : vector<1x16xf32> to vector<12x16xf32>
    %31 = arith.mulf %10, %30 : vector<12x16xf32>
    %32 = vector.broadcast %29 : vector<1x16xf32> to vector<12x16xf32>
    %33 = arith.addf %31, %32 : vector<12x16xf32>
    %cst_7 = arith.constant 0.000000e+00 : f32
    %34 = vector.broadcast %cst_7 : f32 to vector<12x16xf32>
    %35 = arith.maximumf %33, %34 : vector<12x16xf32>
    %cst_8 = arith.constant dense<0.000000e+00> : vector<12x16xf32>
    %36 = tpu.matmul %35, %3, %cst_8 {dimension_numbers = #tpu.dot_dimension_numbers<[1], [0], [0], [1], [0, 0, 1, 1], [], []>} : vector<12x16xf32>, vector<16x16xf32>, vector<12x16xf32> -> vector<12x16xf32>
    %cst_9 = arith.constant dense<0.000000e+00> : vector<12x16xf32>
    %37 = tpu.matmul %1, %36, %cst_9 {dimension_numbers = #tpu.dot_dimension_numbers<[1], [0], [0], [1], [0, 0, 1, 1], [], []>} : vector<12x12xf32>, vector<12x16xf32>, vector<12x16xf32> -> vector<12x16xf32>
    %cst_10 = arith.constant dense<0.000000e+00> : vector<16xf32>
    %38 = vector.multi_reduction <add>, %37, %cst_10 [0] : vector<12x16xf32> to vector<16xf32>
    %39 = vector.shape_cast %38 : vector<16xf32> to vector<1x16xf32>
    %cst_11 = arith.constant 1.200000e+01 : f32
    %40 = vector.broadcast %cst_11 : f32 to vector<1x16xf32>
    %41 = arith.divf %39, %40 : vector<1x16xf32>
    %42 = arith.mulf %37, %37 : vector<12x16xf32>
    %cst_12 = arith.constant dense<0.000000e+00> : vector<16xf32>
    %43 = vector.multi_reduction <add>, %42, %cst_12 [0] : vector<12x16xf32> to vector<16xf32>
    %44 = vector.shape_cast %43 : vector<16xf32> to vector<1x16xf32>
    %cst_13 = arith.constant 1.200000e+01 : f32
    %45 = vector.broadcast %cst_13 : f32 to vector<1x16xf32>
    %46 = arith.divf %44, %45 : vector<1x16xf32>
    %47 = arith.mulf %41, %41 : vector<1x16xf32>
    %48 = arith.subf %46, %47 : vector<1x16xf32>
    %cst_14 = arith.constant 0.000000e+00 : f32
    %49 = vector.broadcast %cst_14 : f32 to vector<1x16xf32>
    %50 = arith.maximumf %48, %49 : vector<1x16xf32>
    %cst_15 = arith.constant 9.99999974E-6 : f32
    %51 = vector.broadcast %cst_15 : f32 to vector<1x16xf32>
    %52 = arith.addf %50, %51 : vector<1x16xf32>
    %53 = math.rsqrt %52 : vector<1x16xf32>
    %54 = arith.mulf %7, %53 : vector<1x16xf32>
    %55 = arith.mulf %41, %54 : vector<1x16xf32>
    %56 = arith.subf %8, %55 : vector<1x16xf32>
    %57 = vector.broadcast %54 : vector<1x16xf32> to vector<12x16xf32>
    %58 = arith.mulf %37, %57 : vector<12x16xf32>
    %59 = vector.broadcast %56 : vector<1x16xf32> to vector<12x16xf32>
    %60 = arith.addf %58, %59 : vector<12x16xf32>
    %cst_16 = arith.constant 0.000000e+00 : f32
    %61 = vector.broadcast %cst_16 : f32 to vector<12x16xf32>
    %62 = arith.maximumf %60, %61 : vector<12x16xf32>
    %cst_17 = arith.constant dense<0.000000e+00> : vector<12x16xf32>
    %63 = tpu.matmul %62, %4, %cst_17 {dimension_numbers = #tpu.dot_dimension_numbers<[1], [0], [0], [1], [0, 0, 1, 1], [], []>} : vector<12x16xf32>, vector<16x16xf32>, vector<12x16xf32> -> vector<12x16xf32>
    %cst_18 = arith.constant dense<0.000000e+00> : vector<12x16xf32>
    %64 = tpu.matmul %1, %63, %cst_18 {dimension_numbers = #tpu.dot_dimension_numbers<[1], [0], [0], [1], [0, 0, 1, 1], [], []>} : vector<12x12xf32>, vector<12x16xf32>, vector<12x16xf32> -> vector<12x16xf32>
    %65 = vector.broadcast %9 : vector<1x16xf32> to vector<12x16xf32>
    %66 = arith.addf %64, %65 : vector<12x16xf32>
    %c0_19 = arith.constant 0 : index
    %c0_20 = arith.constant 0 : index
    %67 = vector.load %arg1[%c0_19, %c0_20] : memref<12x16xf32, #tpu.memory_space<vmem>>, vector<12x16xf32>
    tpu.vector_store %arg1[%c0_19, %c0_20], %66 {strides = array<i32>} : memref<12x16xf32, #tpu.memory_space<vmem>>, vector<12x16xf32>,
    return
  }
}

</mosaic_0001>

<bundles_post_ra>
// kernel: gcn_forward.1
= control target key start
LH: loop header
LB: loop body
LE: loop exit
PB: predicated region body
PF: predicated region fallthrough
CT: control target
= control target key end

     0   :  { %vm24_vm0 = vcmask 1043456   ;;  %vm17_vm1 = vcmask 97280   ;;  %vm627_vm2 = vmmov 1   ;;  %vm105_vm4 = vcmask 125952   ;;  %s731_s0 = inlined_call_operand.vmem [shape: f32[72,16], index: 0, kind: input, shape index: {}]   ;;  %s732_s1 = inlined_call_operand.vmem [shape: f32[12,16], index: 1, kind: output, shape index: {}]  }
   0x1   :  { %v10_v0 = vld [vmem:[%s731_s0 + $0x10] sm:$0xff]  ;;  %v11_v1 = vld [vmem:[%s731_s0 + $0x18] sm:$0xff]  ;;  %vm644_vm3 = vmpackc.low %vm24_vm0, %vm627_vm2  ;;  %vm103_vm5 = vcmask 130048   ;;  %v139_v37 = vlaneseq }
   0x2   :  { %v596_v3 = vpack.c.bf16 %v11_v1, %v10_v0  ;;  %v651_v4 = vld [vmem:[%s731_s0] sm:$0xff]  ;;  %v662_v5 = vld [vmem:[%s731_s0 + $0x8] sm:$0xff]  ;;  %v14_v58 = vld [vmem:[%s731_s0 + $0x30] sm:$0xff] }
   0x3   :  { %565 = vmatprep.mubr.msk.f32.mxu0 %vm17_vm1, %v651_v4  ;;  %v12_v6 = vld [vmem:[%s731_s0 + $0x20] sm:$0xff]  ;;  %v13_v7 = vld [vmem:[%s731_s0 + $0x28] sm:$0xff]  ;;  %v678_v38 = vshrl.u32 %v139_v37, 7  ;;  %v15_v59 = vld [vmem:[%s731_s0 + $0x38] sm:$0xff] }
   0x4   :  { %598 = vmatprep.subr.msk.bf16.mxu0 %vm644_vm3, %v596_v3  ;;  %v602_v8 = vpack.c.bf16 %v13_v7, %v12_v6  ;;  %v683_v39 = vld [vmem:[%s731_s0 + $0x40] sm:$0xff]  ;;  %v612_v60 = vpack.c.bf16 %v15_v59, %v14_v58 }
   0x5   :  { %601 = vmatpush3.bf16.msk.msra.mxu0 %vm644_vm3, %v596_v3  ;;  %v141_v40 = vsub.s32 0, %v678_v38  ;;  %v147_v48 = vsub.s32 1, %v678_v38 }
   0x6   :  { %603 = vmatprep.subr.bf16.mxu1 %v602_v8 }
   0x7   :  { %605 = vmatpush3.bf16.msra.mxu1 %v602_v8 }
   0x8   :  { %566 = vmatmul.mubr.msk.f32.vlgmr.msra.gmra.mrb[0].mxu0 %vm17_vm1, %v662_v5  ;;  %613 = vmatprep.subr.bf16.mxu1 %v612_v60 }
   0x9   :  { %579 = vmatprep.mubr.msk.f32.mxu0 %vm17_vm1, %v651_v4 }
  0xdb   :  { %v567_v9 = vpop.f32.mrb[0].mxu0 }
  0xdc   :  { %v106_v10 = vsel %vm105_vm4, %v567_v9, 0.0  ;;  %v117_v11 = vmul.f32 %v567_v9, %v567_v9  ;;  %v94_v12 = vpop.f32.mrb[1].mxu0 }
  0xdd   :  { %v104_v13 = vsel %vm103_vm5, %v94_v12, 0.0  ;;  %v116_v14 = vmul.f32 %v94_v12, %v94_v12 }
  0xde   :  { %v119_v15 = vsel %vm105_vm4, %v117_v11, 0.0  ;;  %v107_v16 = vadd.f32 %v106_v10, %v104_v13 }
  0xdf   :  { %v118_v17 = vsel %vm103_vm5, %v116_v14, 0.0 }
  0xe0   :  { %v108_v18 = vrot.slane %v107_v16, 4  ;;  %v120_v19 = vadd.f32 %v119_v15, %v118_v17 }
  0xe2   :  { %v109_v20 = vadd.f32 %v108_v18, %v107_v16  ;;  %v121_v21 = vrot.slane %v120_v19, 4 }
  0xe4   :  { %v110_v22 = vrot.slane %v109_v20, 2  ;;  %v122_v23 = vadd.f32 %v121_v21, %v120_v19 }
  0xe6   :  { %v111_v24 = vadd.f32 %v110_v22, %v109_v20  ;;  %v123_v25 = vrot.slane %v122_v23, 2 }
  0xe8   :  { %v112_v26 = vrot.slane %v111_v24, 1  ;;  %v124_v27 = vadd.f32 %v123_v25, %v122_v23 }
  0xea   :  { %v113_v28 = vadd.f32 %v112_v26, %v111_v24  ;;  %v125_v29 = vrot.slane %v124_v27, 1 }
  0xec   :  { %v115_v30 = vmul.f32 0.083333336, %v113_v28  ;;  %v126_v31 = vadd.f32 %v125_v29, %v124_v27  ;;  %v347_v27 = vsub.s32 2, %v678_v38 }
  0xee   :  { %v127_v32 = vmul.f32 0.083333336, %v126_v31  ;;  %v128_v33 = vmul.f32 %v115_v30, %v115_v30 }
  0xf0   :  { %v129_v34 = vsub.f32 %v127_v32, %v128_v33 }
  0xf2   :  { %v130_v35 = vmax.f32 %v129_v34, 0.0 }
  0xf4   :  { %v131_v36 = vadd.f32 1e-05, %v130_v35  ;;  %v353_v35 = vsub.s32 3, %v678_v38 }
  0xf6   :  { %623 = vrsqrt.f32 %v131_v36 }
 0x100   :  { %v624_v41 = vpop.eup %623 }
 0x101   :  { %v133_v42 = vmul.f32 %v624_v41, %v683_v39 }
 0x103   :  { %v142_v43 = vrot.slane %v133_v42, %v141_v40  ;;  %v134_v44 = vmul.f32 %v133_v42, %v115_v30 }
 0x105   :  { %v143_v45 = vmul.f32 %v142_v43, %v94_v12  ;;  %v144_v46 = vmul.f32 %v567_v9, %v142_v43  ;;  %v136_v47 = vrot.slane %v134_v44, 7 }
 0x107   :  { %v138_v49 = vsub.f32 %v683_v39, %v136_v47  ;;  %v442_v47 = vsub.s32 4, %v678_v38 }
 0x109   :  { %v148_v50 = vrot.slane %v138_v49, %v147_v48  ;;  %v443_v48 = vrot.slane %v683_v39, %v442_v47 }
 0x10b   :  { %v149_v51 = vadd.f32 %v148_v50, %v143_v45  ;;  %v150_v52 = vadd.f32 %v148_v50, %v144_v46 }
 0x10d   :  { %v151_v53 = vmax.f32 %v149_v51, 0.0  ;;  %v152_v54 = vmax.f32 %v150_v52, 0.0 }
 0x10f   :  { %572 = vmatprep.mubr.msk.f32.mxu1 %vm103_vm5, %v151_v53 }
 0x110   :  { %573 = vmatmul.mubr.msk.f32.vlgmr.msra.gmra.mrb[0].mxu1 %vm103_vm5, %v152_v54 }
 0x111   :  { %615 = vmatpush3.bf16.msra.mxu1 %v612_v60 }
 0x1e3   :  { %v574_v55 = vpop.f32.mrb[0].mxu1 }
 0x1e4   :  { %v225_v56 = vpop.f32.mrb[1].mxu1 }
 0x1e5   :  { %v606_v57 = vpack.c.bf16 %v574_v55, %v225_v56 }
 0x1e7   :  { %608 = vmatprep.subr.msk.bf16.mxu0 %vm644_vm3, %v606_v57 }
 0x1e8   :  { %611 = vmatpush3.bf16.msk.msra.mxu0 %vm644_vm3, %v606_v57 }
 0x1eb   :  { %580 = vmatmul.mubr.msk.f32.vlgmr.msra.gmra.mrb[2].mxu0 %vm17_vm1, %v662_v5 }
 0x1ec   :  { %593 = vmatprep.mubr.msk.f32.mxu0 %vm17_vm1, %v651_v4 }
 0x2be   :  { %v581_v61 = vpop.f32.mrb[2].mxu0 }
 0x2bf   :  { %v313_v62 = vsel %vm105_vm4, %v581_v61, 0.0  ;;  %v323_v63 = vmul.f32 %v581_v61, %v581_v61  ;;  %v303_v0 = vpop.f32.mrb[3].mxu0 }
 0x2c0   :  { %v312_v1 = vsel %vm103_vm5, %v303_v0, 0.0  ;;  %v322_v3 = vmul.f32 %v303_v0, %v303_v0 }
 0x2c1   :  { %v325_v4 = vsel %vm105_vm4, %v323_v63, 0.0  ;;  %v314_v6 = vadd.f32 %v313_v62, %v312_v1 }
 0x2c2   :  { %v324_v7 = vsel %vm103_vm5, %v322_v3, 0.0 }
 0x2c3   :  { %v315_v8 = vrot.slane %v314_v6, 4  ;;  %v326_v9 = vadd.f32 %v325_v4, %v324_v7 }
 0x2c5   :  { %v316_v10 = vadd.f32 %v315_v8, %v314_v6  ;;  %v327_v11 = vrot.slane %v326_v9, 4 }
 0x2c7   :  { %v317_v12 = vrot.slane %v316_v10, 2  ;;  %v328_v13 = vadd.f32 %v327_v11, %v326_v9 }
 0x2c9   :  { %v318_v14 = vadd.f32 %v317_v12, %v316_v10  ;;  %v329_v15 = vrot.slane %v328_v13, 2 }
 0x2cb   :  { %v319_v16 = vrot.slane %v318_v14, 1  ;;  %v330_v17 = vadd.f32 %v329_v15, %v328_v13 }
 0x2cd   :  { %v320_v18 = vadd.f32 %v319_v16, %v318_v14  ;;  %v331_v19 = vrot.slane %v330_v17, 1 }
 0x2cf   :  { %v321_v20 = vmul.f32 0.083333336, %v320_v18  ;;  %v332_v21 = vadd.f32 %v331_v19, %v330_v17 }
 0x2d1   :  { %v333_v22 = vmul.f32 0.083333336, %v332_v21  ;;  %v334_v23 = vmul.f32 %v321_v20, %v321_v20 }
 0x2d3   :  { %v335_v24 = vsub.f32 %v333_v22, %v334_v23 }
 0x2d5   :  { %v336_v25 = vmax.f32 %v335_v24, 0.0 }
 0x2d7   :  { %v337_v26 = vadd.f32 1e-05, %v336_v25 }
 0x2d9   :  { %625 = vrsqrt.f32 %v337_v26 }
 0x2e3   :  { %v626_v28 = vpop.eup %625 }
 0x2e4   :  { %v339_v29 = vmul.f32 %v626_v28, %v683_v39 }
 0x2e6   :  { %v340_v30 = vmul.f32 %v339_v29, %v321_v20  ;;  %v348_v31 = vrot.slane %v339_v29, %v347_v27 }
 0x2e8   :  { %v342_v32 = vrot.slane %v340_v30, 7  ;;  %v349_v33 = vmul.f32 %v348_v31, %v303_v0  ;;  %v350_v34 = vmul.f32 %v581_v61, %v348_v31 }
 0x2ea   :  { %v344_v36 = vsub.f32 %v683_v39, %v342_v32 }
 0x2ec   :  { %v354_v37 = vrot.slane %v344_v36, %v353_v35 }
 0x2ee   :  { %v355_v40 = vadd.f32 %v354_v37, %v349_v33  ;;  %v356_v41 = vadd.f32 %v354_v37, %v350_v34 }
 0x2f0   :  { %v357_v42 = vmax.f32 %v355_v40, 0.0  ;;  %v358_v43 = vmax.f32 %v356_v41, 0.0 }
 0x2f2   :  { %586 = vmatprep.mubr.msk.f32.mxu1 %vm103_vm5, %v357_v42 }
 0x2f3   :  { %587 = vmatmul.mubr.msk.f32.vlgmr.msra.gmra.mrb[2].mxu1 %vm103_vm5, %v358_v43 }
 0x3c6   :  { %v588_v44 = vpop.f32.mrb[2].mxu1 }
 0x3c7   :  { %v431_v45 = vpop.f32.mrb[3].mxu1 }
 0x3c8   :  { %v616_v46 = vpack.c.bf16 %v588_v44, %v431_v45 }
 0x3ca   :  { %618 = vmatprep.subr.msk.bf16.mxu0 %vm644_vm3, %v616_v46 }
 0x3cb   :  { %621 = vmatpush3.bf16.msk.msra.mxu0 %vm644_vm3, %v616_v46 }
 0x3ce   :  { %594 = vmatmul.mubr.msk.f32.vlgmr.msra.gmra.mrb[4].mxu0 %vm17_vm1, %v662_v5 }
 0x4a1   :  { %v595_v49 = vpop.f32.mrb[4].mxu0 }
 0x4a2   :  { %v519_v50 = vadd.f32 %v595_v49, %v443_v48  ;;  %v513_v51 = vpop.f32.mrb[5].mxu0 }
 0x4a3   :  { %v514_v52 = vadd.f32 %v513_v51, %v443_v48 }
 0x4a4   :  { %523 = vst.msk [vmem:[%s732_s1 + $0x8] sm:$0xf] %vm105_vm4, %v519_v50 }
 0x4a5   :  { %522 = vst.msk [vmem:[%s732_s1] sm:$0xff] %vm103_vm5, %v514_v52 }

</bundles_post_ra>
